<compile_context>
chip_gen: v7x
topology: tpu7x:2x2x1
jax: 0.10.0
libtpu: 0.0.40
codegen_flags: <defaults>
</compile_context>

<pallas_src>
import functools
import math

import jax
import jax.numpy as jnp
from jax.experimental import pallas as pl
from jax.experimental.pallas import tpu as pltpu

_LANE = 128
_SUBLANE = 8


def _cdiv(a, b):
    return -(-a // b)


def _round_up(x, n):
    return _cdiv(x, n) * n


def _lora_kernel(x_ref, wd_ref, wu_ref, o_ref, acc_ref, *, out_chunk):
    # x_ref:  (tm, tk)            activation tile in its ORIGINAL dtype
    # wd_ref: (tk, rank)          down weight (pre-transposed), compute dtype
    # wu_ref: (rank, out_features) up weight (pre-transposed), compute dtype
    # o_ref:  (tm, out_features)  output tile, original activation dtype
    # acc_ref:(tm, rank) f32      K-reduction accumulator (VMEM scratch)
    k = pl.program_id(1)

    @pl.when(k == 0)
    def _init():
        acc_ref[...] = jnp.zeros_like(acc_ref)

    # In-kernel cast (VPU, hidden under DMA/MXU) -- no wrapper-side rewrite of
    # the big activation slab in HBM.
    x = x_ref[...].astype(wd_ref.dtype)
    acc_ref[...] += jnp.dot(x, wd_ref[...], preferred_element_type=jnp.float32)

    @pl.when(k == pl.num_programs(1) - 1)
    def _finish():
        down = acc_ref[...].astype(wu_ref.dtype)
        out_features = o_ref.shape[-1]
        # Chunk the up-projection so the live f32 result is (tm, out_chunk),
        # not (tm, out_features) -- keeps tm large on v7x's 64 MiB VMEM.
        for off in range(0, out_features, out_chunk):
            size = min(out_chunk, out_features - off)
            up = jnp.dot(down, wu_ref[:, off:off + size],
                         preferred_element_type=jnp.float32)
            o_ref[:, off:off + size] = up.astype(o_ref.dtype)


def _k_tile_candidates(in_features):
    """128-multiples that exactly divide in_features (descending, < in_features)."""
    if in_features % _LANE != 0:
        return []
    q = in_features // _LANE
    return [(q // d) * _LANE for d in range(2, q + 1) if q % d == 0]


@functools.partial(
    jax.jit,
    static_argnames=("block_m", "block_k", "out_chunk", "compute_dtype"))
def lora_linear(hidden_states, w_down, w_up, *, block_m=None, block_k=None,
                out_chunk=512, compute_dtype=None):
    """Pallas implementation of LoRALinearLayer.forward.

    hidden_states: (..., in_features), any float dtype
    w_down: (rank, in_features)   -- torch nn.Linear(in, rank).weight layout
    w_up:   (out_features, rank)  -- torch nn.Linear(rank, out).weight layout
    returns: (..., out_features), dtype == hidden_states.dtype
    """
    orig_dtype = hidden_states.dtype
    in_features = hidden_states.shape[-1]
    rank = w_down.shape[0]
    out_features = w_up.shape[0]
    lead_shape = hidden_states.shape[:-1]
    m = math.prod(lead_shape)

    # Compute dtype: narrower of activation / weight dtype unless overridden.
    if compute_dtype is None:
        if jnp.dtype(orig_dtype).itemsize <= jnp.dtype(w_down.dtype).itemsize:
            compute_dtype = orig_dtype
        else:
            compute_dtype = w_down.dtype
    compute_dtype = jnp.dtype(compute_dtype)
    x_bytes = jnp.dtype(orig_dtype).itemsize
    c_bytes = compute_dtype.itemsize

    # Tiny rank-sized weights: transpose + cast in the wrapper (negligible bytes).
    wd_t = jnp.transpose(w_down).astype(compute_dtype)   # (in_features, rank)
    wu_t = jnp.transpose(w_up).astype(compute_dtype)     # (rank, out_features)

    # Effective out chunk (lane-aligned; single chunk if out_features is small).
    if out_features <= out_chunk:
        out_chunk_eff = out_features
    else:
        out_chunk_eff = max(_LANE, (out_chunk // _LANE) * _LANE)

    # ---- generation-aware VMEM budget -------------------------------------
    try:
        vmem_cap = int(pltpu.get_tpu_info().vmem_capacity_bytes)
    except Exception:
        vmem_cap = 64 << 20            # conservative: v7x per-TC physical VMEM
    budget = int(vmem_cap * 0.75)      # ~48 MiB on v7x, ~96 MiB on v5e/v6e

    def _footprint(tm_, tk_):
        x_tiles = 2 * tm_ * tk_ * x_bytes                 # double-buffered x tile
        o_tiles = 2 * tm_ * out_features * x_bytes        # double-buffered out tile
        weights = 2 * (tk_ * rank + rank * out_features) * c_bytes
        acc = tm_ * rank * 4                              # f32 accumulator scratch
        interm = (tm_ * tk_ * c_bytes                     # in-kernel cast copy of x
                  + 2 * tm_ * rank * 4                    # down dot result + staging
                  + tm_ * out_chunk_eff * (4 + x_bytes))  # f32 up chunk + cast chunk
        return x_tiles + o_tiles + weights + acc + interm

    def _fits(tm_, tk_):
        return _footprint(tm_, tk_) <= budget

    # ---- M-tile selection ---------------------------------------------------
    if block_m is not None:
        tm = block_m
    else:
        tm = 512 if c_bytes <= 2 else 256
        # Megacore (v7x): keep grid_m >= 2 so both TensorCores get work.
        if m > 2 * _SUBLANE:
            tm = min(tm, _round_up(_cdiv(m, 2), _SUBLANE))
    tm = min(tm, m)
    if tm < m:
        tm = max(_SUBLANE, (tm // _SUBLANE) * _SUBLANE)

    # ---- K-tile selection (prefer tiling K over shrinking tm) ---------------
    if block_k is not None:
        tk = block_k
        if in_features % tk != 0 or (tk != in_features and tk % _LANE != 0):
            tk = in_features
    else:
        tk = in_features
        if not _fits(tm, tk):
            for cand in _k_tile_candidates(in_features):
                if cand < 1024:
                    break
                tk = cand
                if _fits(tm, tk):
                    break

    # Last resort: shrink tm until the real footprint fits.
    while tm > _SUBLANE and not _fits(tm, tk):
        tm = max(_SUBLANE, ((tm // 2) // _SUBLANE) * _SUBLANE)

    grid_m = _cdiv(m, tm)              # masked tail block handles m % tm != 0
    grid_k = in_features // tk         # exact by construction

    vmem_limit = int(min(max(_footprint(tm, tk) * 5 // 4 + (4 << 20), 16 << 20),
                         vmem_cap - (8 << 20)))

    x2d = hidden_states.reshape(m, in_features)   # no dtype cast here

    cost = pl.CostEstimate(
        flops=2 * m * in_features * rank + 2 * m * rank * out_features,
        transcendentals=0,
        bytes_accessed=(m * in_features * x_bytes
                        + m * out_features * x_bytes
                        + (in_features * rank + rank * out_features) * c_bytes),
    )

    out2d = pl.pallas_call(
        functools.partial(_lora_kernel, out_chunk=out_chunk_eff),
        out_shape=jax.ShapeDtypeStruct((m, out_features), orig_dtype),
        grid_spec=pltpu.PrefetchScalarGridSpec(
            num_scalar_prefetch=0,
            grid=(grid_m, grid_k),
            in_specs=[
                pl.BlockSpec((tm, tk), lambda i, k: (i, k)),
                pl.BlockSpec((tk, rank), lambda i, k: (k, 0)),
                # Constant block index -> fetched once and kept resident.
                pl.BlockSpec((rank, out_features), lambda i, k: (0, 0)),
            ],
            out_specs=pl.BlockSpec((tm, out_features), lambda i, k: (i, 0)),
            scratch_shapes=[pltpu.VMEM((tm, rank), jnp.float32)],
        ),
        compiler_params=pltpu.CompilerParams(
            dimension_semantics=("parallel", "arbitrary"),
            vmem_limit_bytes=vmem_limit,
        ),
        cost_estimate=cost,
    )(x2d, wd_t, wu_t)

    return out2d.reshape(*lead_shape, out_features)


def init_lora_params(key, in_features, out_features, rank, dtype=jnp.float32):
    """Matches LoRALinearLayer.__init__: down ~ N(0, (1/rank)^2), up = 0."""
    if rank > min(in_features, out_features):
        raise ValueError(
            f"LoRA rank {rank} must be less or equal than "
            f"{min(in_features, out_features)}")
    w_down = (1.0 / rank) * jax.random.normal(
        key, (rank, in_features), dtype=dtype)           # nn.Linear(in, rank).weight
    w_up = jnp.zeros((out_features, rank), dtype=dtype)  # nn.Linear(rank, out).weight
    return w_down, w_up


if __name__ == "__main__":
    key = jax.random.PRNGKey(0)
    k_x, k_w, k_chk, k_x3, k_x4, k_w4d, k_w4u = jax.random.split(key, 7)

    batch, seq, in_features, out_features, rank = 2, 8, 32, 32, 16

    # bf16 activations, f32 weights -> exercises in-kernel cast + bf16 compute.
    x = jax.random.normal(k_x, (batch, seq, in_features), dtype=jnp.float32)
    x = x.astype(jnp.bfloat16)
    w_down, w_up = init_lora_params(k_w, in_features, out_features, rank)

    # 1) Faithful init (up == 0) -> output must be exactly zero.
    out = jax.block_until_ready(lora_linear(x, w_down, w_up))
    assert out.shape == (batch, seq, out_features)
    assert out.dtype == x.dtype
    assert jnp.all(out == 0)

    # 2) Nonzero up weight vs pure-JAX reference (bf16 compute, f32 accum).
    w_up_chk = jax.random.normal(k_chk, (out_features, rank), dtype=jnp.float32)
    out_chk = jax.block_until_ready(lora_linear(x, w_down, w_up_chk))
    ref = (x.astype(jnp.float32) @ w_down.T @ w_up_chk.T).astype(x.dtype)
    assert jnp.allclose(out_chk.astype(jnp.float32), ref.astype(jnp.float32),
                        atol=5e-2, rtol=5e-2)

    # 3) Multi-step M grid with a non-divisible (masked) tail block.
    x3 = jax.random.normal(k_x3, (5, 80, in_features), dtype=jnp.float32)
    x3 = x3.astype(jnp.bfloat16)                   # m = 400, block_m = 128 -> 4 steps
    out3 = jax.block_until_ready(lora_linear(x3, w_down, w_up_chk, block_m=128))
    ref3 = (x3.astype(jnp.float32) @ w_down.T @ w_up_chk.T).astype(x3.dtype)
    assert out3.shape == (5, 80, out_features)
    assert jnp.allclose(out3.astype(jnp.float32), ref3.astype(jnp.float32),
                        atol=5e-2, rtol=5e-2)

    # 4) K-tiled reduction (grid_k = 2) + chunked up-projection (128-lane chunks
    #    over out=320 with a ragged final chunk) + multi-step M grid.
    in4, out4, rank4 = 256, 320, 16
    x4 = jax.random.normal(k_x4, (3, 40, in4), dtype=jnp.float32)
    w4_down = (1.0 / rank4) * jax.random.normal(k_w4d, (rank4, in4), dtype=jnp.float32)
    w4_up = jax.random.normal(k_w4u, (out4, rank4), dtype=jnp.float32)
    out4_arr = jax.block_until_ready(
        lora_linear(x4, w4_down, w4_up, block_m=64, block_k=128, out_chunk=128))
    ref4 = x4 @ w4_down.T @ w4_up.T
    assert out4_arr.shape == (3, 40, out4)
    assert jnp.allclose(out4_arr, ref4, atol=5e-2, rtol=5e-2)

    print("KERNEL_OK")
</pallas_src>

<mosaic_0001>
module attributes {stable_mosaic.version = 11 : i64} {
  func.func @_lora_kernel(%arg0: i32, %arg1: i32, %arg2: memref<16x32xbf16, #tpu.memory_space<vmem>>, %arg3: memref<32x16xbf16, #tpu.memory_space<vmem>>, %arg4: memref<16x32xbf16, #tpu.memory_space<vmem>>, %arg5: memref<16x32xbf16, #tpu.memory_space<vmem>>, %arg6: memref<16x16xf32, #tpu.memory_space<vmem>>) attributes {dimension_semantics = [#tpu.dimension_semantics<parallel>, #tpu.dimension_semantics<arbitrary>], iteration_bounds = array<i64: 1, 1>, scalar_prefetch = 0 : i64, scratch_operands = 1 : i64, tpu.core_type = #tpu.core_type<tc>, window_params = [{transform_indices = @transform_0, window_bounds = array<i64: 16, 32>}, {transform_indices = @transform_1, window_bounds = array<i64: 32, 16>}, {pipeline_mode = #tpu.pipeline_mode<synchronous>, transform_indices = @transform_2, window_bounds = array<i64: 16, 32>}, {transform_indices = @transform_3, window_bounds = array<i64: 16, 32>}]} {
    %c0_i32 = arith.constant 0 : i32
    %0 = arith.cmpi eq, %arg1, %c0_i32 : i32
    %1 = arith.extui %0 : i1 to i32
    %c0_i32_0 = arith.constant 0 : i32
    %2 = arith.cmpi ne, %1, %c0_i32_0 : i32
    scf.if %2 {
      %cst_10 = arith.constant 0.000000e+00 : f32
      %12 = vector.broadcast %cst_10 : f32 to vector<16x16xf32>
      %c0_11 = arith.constant 0 : index
      %c0_12 = arith.constant 0 : index
      %13 = vector.load %arg6[%c0_11, %c0_12] : memref<16x16xf32, #tpu.memory_space<vmem>>, vector<16x16xf32>
      tpu.vector_store %arg6[%c0_11, %c0_12], %12 {strides = array<i32>} : memref<16x16xf32, #tpu.memory_space<vmem>>, vector<16x16xf32>,
    } else {
    }
    %c0 = arith.constant 0 : index
    %c0_1 = arith.constant 0 : index
    %3 = vector.load %arg2[%c0, %c0_1] : memref<16x32xbf16, #tpu.memory_space<vmem>>, vector<16x32xbf16>
    %c0_2 = arith.constant 0 : index
    %c0_3 = arith.constant 0 : index
    %4 = vector.load %arg6[%c0_2, %c0_3] : memref<16x16xf32, #tpu.memory_space<vmem>>, vector<16x16xf32>
    %c0_4 = arith.constant 0 : index
    %c0_5 = arith.constant 0 : index
    %5 = vector.load %arg3[%c0_4, %c0_5] : memref<32x16xbf16, #tpu.memory_space<vmem>>, vector<32x16xbf16>
    %cst = arith.constant dense<0.000000e+00> : vector<16x16xf32>
    %6 = tpu.matmul %3, %5, %cst {dimension_numbers = #tpu.dot_dimension_numbers<[1], [0], [0], [1], [0, 0, 1, 1], [], []>} : vector<16x32xbf16>, vector<32x16xbf16>, vector<16x16xf32> -> vector<16x16xf32>
    %7 = arith.addf %4, %6 : vector<16x16xf32>
    %c0_6 = arith.constant 0 : index
    %c0_7 = arith.constant 0 : index
    %8 = vector.load %arg6[%c0_6, %c0_7] : memref<16x16xf32, #tpu.memory_space<vmem>>, vector<16x16xf32>
    tpu.vector_store %arg6[%c0_6, %c0_7], %7 {strides = array<i32>} : memref<16x16xf32, #tpu.memory_space<vmem>>, vector<16x16xf32>,
    %c0_i32_8 = arith.constant 0 : i32
    %9 = arith.cmpi eq, %arg1, %c0_i32_8 : i32
    %10 = arith.extui %9 : i1 to i32
    %c0_i32_9 = arith.constant 0 : i32
    %11 = arith.cmpi ne, %10, %c0_i32_9 : i32
    scf.if %11 {
      %c0_10 = arith.constant 0 : index
      %c0_11 = arith.constant 0 : index
      %12 = vector.load %arg6[%c0_10, %c0_11] : memref<16x16xf32, #tpu.memory_space<vmem>>, vector<16x16xf32>
      %13 = arith.truncf %12 : vector<16x16xf32> to vector<16x16xbf16>
      %c0_12 = arith.constant 0 : index
      %c0_13 = arith.constant 0 : index
      %14 = vector.load %arg4[%c0_12, %c0_13] : memref<16x32xbf16, #tpu.memory_space<vmem>>, vector<16x32xbf16>
      %cst_14 = arith.constant dense<0.000000e+00> : vector<16x32xf32>
      %15 = tpu.matmul %13, %14, %cst_14 {dimension_numbers = #tpu.dot_dimension_numbers<[1], [0], [0], [1], [0, 0, 1, 1], [], []>} : vector<16x16xbf16>, vector<16x32xbf16>, vector<16x32xf32> -> vector<16x32xf32>
      %16 = arith.truncf %15 : vector<16x32xf32> to vector<16x32xbf16>
      %c0_15 = arith.constant 0 : index
      %c0_16 = arith.constant 0 : index
      %17 = vector.load %arg5[%c0_15, %c0_16] : memref<16x32xbf16, #tpu.memory_space<vmem>>, vector<16x32xbf16>
      tpu.vector_store %arg5[%c0_15, %c0_16], %16 {strides = array<i32>} : memref<16x32xbf16, #tpu.memory_space<vmem>>, vector<16x32xbf16>,
    } else {
    }
    return
  }
  func.func @transform_0(%arg0: i32, %arg1: i32) -> (i32, i32) {
    %c0_i32 = arith.constant 0 : i32
    return %arg0, %arg1 : i32, i32
  }
  func.func @transform_1(%arg0: i32, %arg1: i32) -> (i32, i32) {
    %c0_i32 = arith.constant 0 : i32
    %c0_i32_0 = arith.constant 0 : i32
    return %arg1, %c0_i32 : i32, i32
  }
  func.func @transform_2(%arg0: i32, %arg1: i32) -> (i32, i32) {
    %c0_i32 = arith.constant 0 : i32
    %c0_i32_0 = arith.constant 0 : i32
    %c0_i32_1 = arith.constant 0 : i32
    return %c0_i32, %c0_i32_0 : i32, i32
  }
  func.func @transform_3(%arg0: i32, %arg1: i32) -> (i32, i32) {
    %c0_i32 = arith.constant 0 : i32
    %c0_i32_0 = arith.constant 0 : i32
    return %arg0, %c0_i32 : i32, i32
  }
}

</mosaic_0001>

<bundles_post_ra>
// kernel: lora_linear.1
= control target key start
LH: loop header
LB: loop body
LE: loop exit
PB: predicated region body
PF: predicated region fallthrough
CT: control target
= control target key end

     0   :  { %v245_v1 = vmov 0.0   ;;  %vm246_vm0 = vmmov 0   ;;  %vm20_vm1 = vcmask 130048   ;;  %s299_s0 = inlined_call_operand.vmem [shape: bf16[16,32], index: 0, kind: input, shape index: {}]   ;;  %s300_s1 = inlined_call_operand.vmem [shape: bf16[32,16], index: 1, kind: input, shape index: {}]   ;;  %s301_s2 = inlined_call_operand.vmem [shape: bf16[16,32], index: 2, kind: input, shape index: {}]   ;;  %s302_s3 = inlined_call_operand.hbm [shape: bf16[16,32], index: 3, kind: output, shape index: {}]  }
   0x1   :  { %v217_v0 = vld [vmem:[%s300_s1] sm:$0xff]   ;;  %198 = vmatprep.subr.bf16.mxu0 %v245_v1  ;;  %206 = vmatprep.subr.bf16.mxu1 %v245_v1  ;;  %v218_v2 = vld [vmem:[%s300_s1 + $0x8] sm:$0xff]   ;;  %21 = vst.msk [vmem:[#allocation2] sm:$0xff] %vm20_vm1, %v245_v1  ;;  %22 = vst.msk [vmem:[#allocation2 + $0x8] sm:$0xff] %vm20_vm1, %v245_v1 }
   0x2   :  { %199 = vmatpush3.bf16.msra.mxu0 %v217_v0  ;;  %202 = vmatprep.mubr.msk.bf16.mxu0 %vm246_vm0, %v245_v1 }
   0x3   :  { %200 = vmatprep.subr.bf16.mxu0 %v245_v1  ;;  %208 = vmatprep.mubr.msk.bf16.mxu1 %vm246_vm0, %v245_v1 }
   0x4   :  { %8 = vsyncpa [#allocation4], 0  ;;  %v219_v3 = vld [vmem:[%s299_s0] sm:$0xff]   ;;  %vm48_vm2 = vcmask 261120   ;;  %s247_s0 = smov [#allocation3]   ;;  %vm164_vm3 = vcmask 257024  }
   0x5   :  { %v220_v4 = vld [vmem:[%s301_s2] sm:$0xff]   ;;  %s172_s1 = sshll.u32 %s247_s0, 4  ;;  %s173_s1 = int_to_ptr.vmem [resolvable:$true] %s172_s1 }
   0x6   :  { %201 = vmatpush3.bf16.msra.mxu0 %v218_v2  ;;  %207 = vmatpush3.bf16.msra.mxu1 %v220_v4  ;;  %s221_s2 = scalar_lea.vmem %s173_s1, 128  ;;  %p226_p1 = scmp.lt.s32.totalorder %s173_s1, %s173_s1 }
   0x7   :  { %p222_p0 = scmp.ne.s32.totalorder %s173_s1, %s221_s2  ;;  %p227_p2 = scmp.lt.s32.totalorder %s221_s2, %s221_s2 }
   0x8   :  { %v25_v5 = vld [vmem:[#allocation2] sm:$0xff]  ;;  %v26_v7 = vld [vmem:[#allocation2 + $0x8] sm:$0xff] }
   0x9   :  { %203 = vmatmul.mubr.msk.bf16.vlgmr.msra.gmra.mrb[0].mxu0 %vm48_vm2, %v219_v3  ;;  %p228_p3 = por %p227_p2, %p226_p1 }
   0xb   :  { %p229_p4 = pnand %p228_p3, %p222_p0 }
  0xdc   :  { %v86_v6 = vpop.f32.mrb[0].mxu0 }
  0xdd   :  { %v93_v8 = vadd.f32 %v86_v6, %v25_v5  ;;  %v204_v9 = vpop.f32.mrb[1].mxu0 }
  0xde   :  { %v89_v10 = vpop.f32.mrb[2].mxu0 }
  0xdf   :  { %96 = vst.msk [vmem:[#allocation2] sm:$0xff] %vm20_vm1, %v93_v8  ;;  %v94_v11 = vadd.f32 %v89_v10, %v26_v7  ;;  %v205_v12 = vpop.f32.mrb[3].mxu0 }
  0xe1   :  { %97 = vst.msk [vmem:[#allocation2 + $0x8] sm:$0xff] %vm20_vm1, %v94_v11 }
  0xe6   :  { %v101_v13 = vld [vmem:[#allocation2] sm:$0xff] }
  0xe8   :  { %v102_v14 = vld [vmem:[#allocation2 + $0x8] sm:$0xff] }
  0xe9   :  { %v103_v15 = vpack.c.bf16 %v102_v14, %v101_v13 }
  0xeb   :  { %209 = vmatmul.mubr.msk.bf16.vlgmr.msra.gmra.mrb[0].mxu1 %vm20_vm1, %v103_v15 }
 0x1be   :  { %v149_v16 = vpop.f32.mrb[0].mxu1 }
 0x1bf   :  { %v191_v17 = vpack.c.bf16 %v149_v16, %v149_v16  ;;  %v210_v18 = vpop.f32.mrb[1].mxu1 }
 0x1c0   :  { %v152_v19 = vpop.f32.mrb[2].mxu1 }
 0x1c1   :  { %165 = vst.msk [vmem:[#allocation3] sm:$0xf] %vm164_vm3, %v191_v17  ;;  %v192_v20 = vpack.c.bf16 %v152_v19, %v152_v19  ;;  %v211_v21 = vpop.f32.mrb[3].mxu1 }
 0x1c3   :  { %166 = vst.msk [vmem:[#allocation3 + $0x4] sm:$0xf] %vm164_vm3, %v192_v20 }
 0x1c4   :  { %232 = shalt.err (!%p229_p4)
}
 0x1c5   :  { %s233_s22 = scalar_lea.hbm %s302_s3, 128 }
 0x1c6   :  { %p234_p5 = scmp.ne.s32.totalorder %s302_s3, %s233_s22  ;;  %p237_p6 = scmp.lt.u32.totalorder %s233_s22, %s302_s3 }
 0x1c8   :  { %p239_p7 = pnand %p237_p6, %p234_p5 }
 0x1ca   :  { %242 = shalt.err (!%p239_p7)
}
 0x1cb   :  { %s248_s27 = smov 64   ;;  %s249_s28 = smov 4  }
 0x1cc   :  { %178 = dma.vmem_to_hbm [thread:$0]  %s173_s1, 128, %s302_s3, [#allocation4], %s248_s27, %s248_s27, %s249_s28  }
 0x1cd   :  { %243 = dma.done.wait [#allocation4], 128  }
 0x1ce   :  { %244 = vsyncadd [#allocation4], 4294967168 }
 0x1cf   :  { %182 = vsyncpa [#allocation4], 1 }

</bundles_post_ra>
